<compile_context>
chip_gen: v7x
topology: tpu7x:2x2x1
jax: 0.10.0
libtpu: 0.0.40
codegen_flags: <defaults>
</compile_context>

<pallas_src>
import functools

import numpy as np
import jax
import jax.numpy as jnp
from jax.experimental import pallas as pl
from jax.experimental.pallas import tpu as pltpu

_LANE = 128        # vreg lane width
_SUBLANE = 8       # f32 sublane count
_MAX_TILE_B = 512  # cap on batch-tile rows
_MIN_SPLIT_ROWS = 256  # batches >= 2*this get >=2 grid steps (both TCs on v7x)


def _round_up(x, m):
    return ((x + m - 1) // m) * m


def _vmem_capacity_bytes():
    try:
        return int(pltpu.get_tpu_info().vmem_capacity_bytes)
    except Exception:
        return 64 * 1024 * 1024  # conservative default (v7x per-core VMEM)


# ---------------------------------------------------------------------------
# Kernel: fused Linear->ReLU x3 on one batch tile.  Matmul operands are in the
# lane-padded compute dtype (bf16 by default); accumulation, bias add and ReLU
# run in f32.  Every operand is lane-dense (feature dims padded to 128) so the
# MXU sees full tiles and the output store is unmasked.
# ---------------------------------------------------------------------------
def _mlp_kernel(x_ref, w1_ref, b1_ref, w2_ref, b2_ref, w3_ref, b3_ref, o_ref):
    h = jnp.dot(x_ref[...], w1_ref[...], preferred_element_type=jnp.float32)
    h = jnp.maximum(h + b1_ref[...], 0.0)
    h = jnp.dot(h.astype(w2_ref.dtype), w2_ref[...],
                preferred_element_type=jnp.float32)
    h = jnp.maximum(h + b2_ref[...], 0.0)
    h = jnp.dot(h.astype(w3_ref.dtype), w3_ref[...],
                preferred_element_type=jnp.float32)
    h = jnp.maximum(h + b3_ref[...], 0.0)
    o_ref[...] = h.astype(o_ref.dtype)


@functools.partial(
    jax.jit,
    static_argnames=("tile_b", "single_buffer_weights", "out_dtype",
                     "vmem_limit_bytes"),
)
def _mlp_padded(x_p, w1_p, b1_p, w2_p, b2_p, w3_p, b3_p, *, tile_b,
                single_buffer_weights, out_dtype, vmem_limit_bytes):
    """All operands already padded: x_p [Bp, in_p]; weights [in_p, out_p];
    biases [1, out_p] (f32).  Returns padded output [Bp, out_p]."""
    Bp, in_p = x_p.shape
    hid_p = w1_p.shape[1]
    out_p = w3_p.shape[1]
    grid = (Bp // tile_b,)

    def _resident(shape):
        # Constant index_map -> block is resident for every grid step.
        # Single-buffering halves its VMEM footprint (double-buffering a
        # constant block buys nothing).
        kwargs = {}
        if single_buffer_weights:
            kwargs["pipeline_mode"] = pl.Buffered(1)
        return pl.BlockSpec(shape, lambda i: (0, 0), **kwargs)

    c_bytes = x_p.dtype.itemsize
    o_bytes = np.dtype(out_dtype).itemsize
    flops = 2 * Bp * (in_p * hid_p + hid_p * hid_p + hid_p * out_p)
    bytes_accessed = (
        Bp * in_p * c_bytes
        + (in_p * hid_p + hid_p * hid_p + hid_p * out_p) * c_bytes
        + (2 * hid_p + out_p) * 4
        + Bp * out_p * o_bytes
    )

    return pl.pallas_call(
        _mlp_kernel,
        out_shape=jax.ShapeDtypeStruct((Bp, out_p), out_dtype),
        grid_spec=pltpu.PrefetchScalarGridSpec(
            num_scalar_prefetch=0,
            grid=grid,
            in_specs=[
                # batch-tiled activations
                pl.BlockSpec((tile_b, in_p), lambda i: (i, 0)),
                # resident weights / biases
                _resident((in_p, hid_p)),
                _resident((1, hid_p)),
                _resident((hid_p, hid_p)),
                _resident((1, hid_p)),
                _resident((hid_p, out_p)),
                _resident((1, out_p)),
            ],
            out_specs=pl.BlockSpec((tile_b, out_p), lambda i: (i, 0)),
        ),
        compiler_params=pltpu.CompilerParams(
            dimension_semantics=("parallel",),
            vmem_limit_bytes=vmem_limit_bytes,
        ),
        cost_estimate=pl.CostEstimate(
            flops=int(flops),
            transcendentals=0,
            bytes_accessed=int(bytes_accessed),
        ),
    )(x_p, w1_p, b1_p, w2_p, b2_p, w3_p, b3_p)


# Cached decision on whether pipeline_mode=pl.Buffered(1) is supported.
_BUFFERED_SUPPORTED = None


def _call_mlp(*arrays, tile_b, out_dtype, vmem_limit_bytes):
    global _BUFFERED_SUPPORTED
    if _BUFFERED_SUPPORTED is None:
        if not hasattr(pl, "Buffered"):
            _BUFFERED_SUPPORTED = False
        else:
            try:
                out = _mlp_padded(*arrays, tile_b=tile_b,
                                  single_buffer_weights=True,
                                  out_dtype=out_dtype,
                                  vmem_limit_bytes=vmem_limit_bytes)
                _BUFFERED_SUPPORTED = True
                return out
            except Exception:
                _BUFFERED_SUPPORTED = False
    return _mlp_padded(*arrays, tile_b=tile_b,
                       single_buffer_weights=_BUFFERED_SUPPORTED,
                       out_dtype=out_dtype,
                       vmem_limit_bytes=vmem_limit_bytes)


def prepare_params(w1, b1, w2, b2, w3, b3, *, compute_dtype=jnp.bfloat16):
    """Pad (to 128-lane multiples) and cast the parameters ONCE at init.

    Weights are expected pre-transposed vs. PyTorch: [in_features, out_features].
    Biases may be [out] or [1, out].  Reuse the returned dict for every
    forward call so no per-call HBM traffic is spent on padding weights.
    """
    in_dim, hidden = w1.shape
    num_classes = w3.shape[1]
    in_p = _round_up(in_dim, _LANE)
    hid_p = _round_up(hidden, _LANE)
    out_p = _round_up(num_classes, _LANE)

    def pad2(a, rows, cols, dtype):
        a = jnp.asarray(a, dtype)
        if a.shape == (rows, cols):
            return a  # already aligned: no copy
        return jnp.zeros((rows, cols), dtype).at[:a.shape[0], :a.shape[1]].set(a)

    cd = np.dtype(compute_dtype)
    return {
        "w1": pad2(w1, in_p, hid_p, cd),
        "b1": pad2(jnp.reshape(b1, (1, -1)), 1, hid_p, jnp.float32),
        "w2": pad2(w2, hid_p, hid_p, cd),
        "b2": pad2(jnp.reshape(b2, (1, -1)), 1, hid_p, jnp.float32),
        "w3": pad2(w3, hid_p, out_p, cd),
        "b3": pad2(jnp.reshape(b3, (1, -1)), 1, out_p, jnp.float32),
        "dims": (in_dim, hidden, num_classes),
        "padded_dims": (in_p, hid_p, out_p),
        "compute_dtype": cd,
    }


def _choose_tile_and_vmem(B, in_p, hid_p, out_p, compute_itemsize, out_itemsize):
    """Derive the batch tile and scoped-VMEM limit from actual VMEM capacity."""
    vmem_cap = _vmem_capacity_bytes()
    vmem_limit = int(min(max(vmem_cap * 0.8, 32 * 2**20), 112 * 2**20))
    budget = int(vmem_cap * 0.55)  # leave headroom for compiler scratch

    # Resident weights/biases (single-buffered).
    weight_bytes = (in_p * hid_p + hid_p * hid_p + hid_p * out_p) * compute_itemsize
    bias_bytes = (2 * hid_p + out_p) * 4
    avail = budget - weight_bytes - bias_bytes

    # Per-batch-row cost: double-buffered x tile + double-buffered out tile
    # + f32 intermediates (h1, h2, h3).
    per_row = (in_p * compute_itemsize * 2 + out_p * out_itemsize * 2
               + (2 * hid_p + out_p) * 4)
    if avail < per_row * _SUBLANE:
        # TODO(synk): N/K-tiled fallback when weights do not fit in VMEM.
        max_rows = _SUBLANE
    else:
        max_rows = (avail // per_row) // _SUBLANE * _SUBLANE

    Bp8 = _round_up(B, _SUBLANE)
    tile_b = min(Bp8, _MAX_TILE_B, max_rows)
    # Big batches get >=2 grid steps so the 'parallel' axis shards across both
    # TensorCores on v7x (neutral on single-TC v5e/v6e).
    if Bp8 >= 2 * _MIN_SPLIT_ROWS:
        tile_b = min(tile_b, _round_up((Bp8 + 1) // 2, _SUBLANE))
    tile_b = max(_SUBLANE, _round_up(tile_b, _SUBLANE))
    return tile_b, vmem_limit


def neural_net_forward(x, params, *, tile_b=None):
    """Forward pass of NeuralNet.

    x:      [B, input_size]
    params: output of `prepare_params` (padded weights/biases, done once).
    Returns [B, num_classes] in x.dtype.
    """
    B, in_dim = x.shape
    d_in, d_hid, d_out = params["dims"]
    in_p, hid_p, out_p = params["padded_dims"]
    assert in_dim == d_in, "input feature dim mismatch"
    cd = params["compute_dtype"]
    out_dtype = np.dtype(x.dtype)

    if tile_b is None:
        tile_b, vmem_limit = _choose_tile_and_vmem(
            B, in_p, hid_p, out_p, cd.itemsize, out_dtype.itemsize)
    else:
        tile_b = max(_SUBLANE, _round_up(tile_b, _SUBLANE))
        vmem_limit = int(min(max(_vmem_capacity_bytes() * 0.8, 32 * 2**20),
                             112 * 2**20))
    Bp = _round_up(B, tile_b)

    # Pad/cast activations only when actually needed (ragged batch/features);
    # the aligned case is a pure dtype cast (or a no-op for f32 compute).
    if Bp == B and in_p == in_dim:
        x_p = x.astype(cd)
    else:
        x_p = jnp.zeros((Bp, in_p), cd).at[:B, :in_dim].set(x.astype(cd))

    out_padded = _call_mlp(
        x_p, params["w1"], params["b1"], params["w2"], params["b2"],
        params["w3"], params["b3"],
        tile_b=tile_b, out_dtype=out_dtype, vmem_limit_bytes=vmem_limit)

    if Bp == B and out_p == d_out:
        return out_padded
    return out_padded[:B, :d_out]


def _init_linear(key, fan_in, fan_out):
    # Deterministic init mimicking PyTorch's default (uniform +/- 1/sqrt(fan_in)).
    kw, kb = jax.random.split(key)
    bound = 1.0 / float(np.sqrt(fan_in))
    w = jax.random.uniform(kw, (fan_in, fan_out), jnp.float32, -bound, bound)
    b = jax.random.uniform(kb, (1, fan_out), jnp.float32, -bound, bound)
    return w, b


def _reference(x, w1, b1, w2, b2, w3, b3):
    h = jnp.maximum(x @ w1 + b1, 0.0)
    h = jnp.maximum(h @ w2 + b2, 0.0)
    return jnp.maximum(h @ w3 + b3, 0.0)


if __name__ == "__main__":
    # Small shapes consistent with the module: batch=16, input_size=64,
    # hidden_size=32, num_classes=16.
    batch, input_size, hidden_size, num_classes = 16, 64, 32, 16

    root = jax.random.PRNGKey(0)
    kx, k1, k2, k3 = jax.random.split(root, 4)

    x = jax.random.normal(kx, (batch, input_size), jnp.float32)
    w1, b1 = _init_linear(k1, input_size, hidden_size)
    w2, b2 = _init_linear(k2, hidden_size, hidden_size)
    w3, b3 = _init_linear(k3, hidden_size, num_classes)

    ref = _reference(x, w1, b1, w2, b2, w3, b3)

    # f32-operand path: matches the f32 reference tightly.
    params_f32 = prepare_params(w1, b1, w2, b2, w3, b3,
                                compute_dtype=jnp.float32)
    out_f32 = jax.block_until_ready(neural_net_forward(x, params_f32))
    assert out_f32.shape == (batch, num_classes)
    assert jnp.allclose(out_f32, ref, atol=1e-5, rtol=1e-5), "f32 path mismatch"

    # Default bf16-operand path (MXU-native on v5e/v6e/v7x): f32 accumulation,
    # so only bf16 input-rounding error vs. the f32 reference.
    params_bf16 = prepare_params(w1, b1, w2, b2, w3, b3,
                                 compute_dtype=jnp.bfloat16)
    out_bf16 = jax.block_until_ready(neural_net_forward(x, params_bf16))
    assert out_bf16.shape == (batch, num_classes)
    assert jnp.allclose(out_bf16, ref, atol=3e-2, rtol=3e-2), "bf16 path mismatch"

    print("KERNEL_OK")
</pallas_src>

<mosaic_0001>
module attributes {stable_mosaic.version = 11 : i64} {
  func.func @_mlp_kernel(%arg0: i32, %arg1: memref<16x128xf32, #tpu.memory_space<vmem>>, %arg2: memref<128x128xf32, #tpu.memory_space<vmem>>, %arg3: memref<1x128xf32, #tpu.memory_space<vmem>>, %arg4: memref<128x128xf32, #tpu.memory_space<vmem>>, %arg5: memref<1x128xf32, #tpu.memory_space<vmem>>, %arg6: memref<128x128xf32, #tpu.memory_space<vmem>>, %arg7: memref<1x128xf32, #tpu.memory_space<vmem>>, %arg8: memref<16x128xf32, #tpu.memory_space<vmem>>) attributes {dimension_semantics = [#tpu.dimension_semantics<parallel>], iteration_bounds = array<i64: 1>, scalar_prefetch = 0 : i64, scratch_operands = 0 : i64, tpu.core_type = #tpu.core_type<tc>, window_params = [{transform_indices = @transform_0, window_bounds = array<i64: 16, 128>}, {pipeline_mode = #tpu.pipeline_mode<synchronous>, transform_indices = @transform_1, window_bounds = array<i64: 128, 128>}, {pipeline_mode = #tpu.pipeline_mode<synchronous>, transform_indices = @transform_2, window_bounds = array<i64: 1, 128>}, {pipeline_mode = #tpu.pipeline_mode<synchronous>, transform_indices = @transform_3, window_bounds = array<i64: 128, 128>}, {pipeline_mode = #tpu.pipeline_mode<synchronous>, transform_indices = @transform_4, window_bounds = array<i64: 1, 128>}, {pipeline_mode = #tpu.pipeline_mode<synchronous>, transform_indices = @transform_5, window_bounds = array<i64: 128, 128>}, {pipeline_mode = #tpu.pipeline_mode<synchronous>, transform_indices = @transform_6, window_bounds = array<i64: 1, 128>}, {transform_indices = @transform_7, window_bounds = array<i64: 16, 128>}]} {
    %c0 = arith.constant 0 : index
    %c0_0 = arith.constant 0 : index
    %0 = vector.load %arg1[%c0, %c0_0] : memref<16x128xf32, #tpu.memory_space<vmem>>, vector<16x128xf32>
    %c0_1 = arith.constant 0 : index
    %c0_2 = arith.constant 0 : index
    %1 = vector.load %arg2[%c0_1, %c0_2] : memref<128x128xf32, #tpu.memory_space<vmem>>, vector<128x128xf32>
    %cst = arith.constant dense<0.000000e+00> : vector<16x128xf32>
    %2 = tpu.matmul %0, %1, %cst {dimension_numbers = #tpu.dot_dimension_numbers<[1], [0], [0], [1], [0, 0, 1, 1], [], []>} : vector<16x128xf32>, vector<128x128xf32>, vector<16x128xf32> -> vector<16x128xf32>
    %c0_3 = arith.constant 0 : index
    %c0_4 = arith.constant 0 : index
    %3 = vector.load %arg3[%c0_3, %c0_4] : memref<1x128xf32, #tpu.memory_space<vmem>>, vector<1x128xf32>
    %4 = vector.broadcast %3 : vector<1x128xf32> to vector<16x128xf32>
    %5 = arith.addf %2, %4 : vector<16x128xf32>
    %cst_5 = arith.constant 0.000000e+00 : f32
    %6 = vector.broadcast %cst_5 : f32 to vector<16x128xf32>
    %7 = arith.maximumf %5, %6 : vector<16x128xf32>
    %c0_6 = arith.constant 0 : index
    %c0_7 = arith.constant 0 : index
    %8 = vector.load %arg4[%c0_6, %c0_7] : memref<128x128xf32, #tpu.memory_space<vmem>>, vector<128x128xf32>
    %cst_8 = arith.constant dense<0.000000e+00> : vector<16x128xf32>
    %9 = tpu.matmul %7, %8, %cst_8 {dimension_numbers = #tpu.dot_dimension_numbers<[1], [0], [0], [1], [0, 0, 1, 1], [], []>} : vector<16x128xf32>, vector<128x128xf32>, vector<16x128xf32> -> vector<16x128xf32>
    %c0_9 = arith.constant 0 : index
    %c0_10 = arith.constant 0 : index
    %10 = vector.load %arg5[%c0_9, %c0_10] : memref<1x128xf32, #tpu.memory_space<vmem>>, vector<1x128xf32>
    %11 = vector.broadcast %10 : vector<1x128xf32> to vector<16x128xf32>
    %12 = arith.addf %9, %11 : vector<16x128xf32>
    %cst_11 = arith.constant 0.000000e+00 : f32
    %13 = vector.broadcast %cst_11 : f32 to vector<16x128xf32>
    %14 = arith.maximumf %12, %13 : vector<16x128xf32>
    %c0_12 = arith.constant 0 : index
    %c0_13 = arith.constant 0 : index
    %15 = vector.load %arg6[%c0_12, %c0_13] : memref<128x128xf32, #tpu.memory_space<vmem>>, vector<128x128xf32>
    %cst_14 = arith.constant dense<0.000000e+00> : vector<16x128xf32>
    %16 = tpu.matmul %14, %15, %cst_14 {dimension_numbers = #tpu.dot_dimension_numbers<[1], [0], [0], [1], [0, 0, 1, 1], [], []>} : vector<16x128xf32>, vector<128x128xf32>, vector<16x128xf32> -> vector<16x128xf32>
    %c0_15 = arith.constant 0 : index
    %c0_16 = arith.constant 0 : index
    %17 = vector.load %arg7[%c0_15, %c0_16] : memref<1x128xf32, #tpu.memory_space<vmem>>, vector<1x128xf32>
    %18 = vector.broadcast %17 : vector<1x128xf32> to vector<16x128xf32>
    %19 = arith.addf %16, %18 : vector<16x128xf32>
    %cst_17 = arith.constant 0.000000e+00 : f32
    %20 = vector.broadcast %cst_17 : f32 to vector<16x128xf32>
    %21 = arith.maximumf %19, %20 : vector<16x128xf32>
    %c0_18 = arith.constant 0 : index
    %c0_19 = arith.constant 0 : index
    %22 = vector.load %arg8[%c0_18, %c0_19] : memref<16x128xf32, #tpu.memory_space<vmem>>, vector<16x128xf32>
    tpu.vector_store %arg8[%c0_18, %c0_19], %21 {strides = array<i32>} : memref<16x128xf32, #tpu.memory_space<vmem>>, vector<16x128xf32>,
    return
  }
  func.func @transform_0(%arg0: i32) -> (i32, i32) {
    %c0_i32 = arith.constant 0 : i32
    %c0_i32_0 = arith.constant 0 : i32
    return %arg0, %c0_i32 : i32, i32
  }
  func.func @transform_1(%arg0: i32) -> (i32, i32) {
    %c0_i32 = arith.constant 0 : i32
    %c0_i32_0 = arith.constant 0 : i32
    %c0_i32_1 = arith.constant 0 : i32
    return %c0_i32, %c0_i32_0 : i32, i32
  }
  func.func @transform_2(%arg0: i32) -> (i32, i32) {
    %c0_i32 = arith.constant 0 : i32
    %c0_i32_0 = arith.constant 0 : i32
    %c0_i32_1 = arith.constant 0 : i32
    return %c0_i32, %c0_i32_0 : i32, i32
  }
  func.func @transform_3(%arg0: i32) -> (i32, i32) {
    %c0_i32 = arith.constant 0 : i32
    %c0_i32_0 = arith.constant 0 : i32
    %c0_i32_1 = arith.constant 0 : i32
    return %c0_i32, %c0_i32_0 : i32, i32
  }
  func.func @transform_4(%arg0: i32) -> (i32, i32) {
    %c0_i32 = arith.constant 0 : i32
    %c0_i32_0 = arith.constant 0 : i32
    %c0_i32_1 = arith.constant 0 : i32
    return %c0_i32, %c0_i32_0 : i32, i32
  }
  func.func @transform_5(%arg0: i32) -> (i32, i32) {
    %c0_i32 = arith.constant 0 : i32
    %c0_i32_0 = arith.constant 0 : i32
    %c0_i32_1 = arith.constant 0 : i32
    return %c0_i32, %c0_i32_0 : i32, i32
  }
  func.func @transform_6(%arg0: i32) -> (i32, i32) {
    %c0_i32 = arith.constant 0 : i32
    %c0_i32_0 = arith.constant 0 : i32
    %c0_i32_1 = arith.constant 0 : i32
    return %c0_i32, %c0_i32_0 : i32, i32
  }
  func.func @transform_7(%arg0: i32) -> (i32, i32) {
    %c0_i32 = arith.constant 0 : i32
    %c0_i32_0 = arith.constant 0 : i32
    return %arg0, %c0_i32 : i32, i32
  }
}

module attributes {stable_mosaic.version = 11 : i64} {
  func.func @_mlp_kernel(%arg0: i32, %arg1: memref<16x128xf32, #tpu.memory_space<vmem>>, %arg2: memref<128x128xf32, #tpu.memory_space<vmem>>, %arg3: memref<1x128xf32, #tpu.memory_space<vmem>>, %arg4: memref<128x128xf32, #tpu.memory_space<vmem>>, %arg5: memref<1x128xf32, #tpu.memory_space<vmem>>, %arg6: memref<128x128xf32, #tpu.memory_space<vmem>>, %arg7: memref<1x128xf32, #tpu.memory_space<vmem>>, %arg8: memref<16x128xf32, #tpu.memory_space<vmem>>) attributes {dimension_semantics = [#tpu.dimension_semantics<parallel>], iteration_bounds = array<i64: 1>, scalar_prefetch = 0 : i64, scratch_operands = 0 : i64, tpu.core_type = #tpu.core_type<tc>, window_params = [{transform_indices = @transform_0, window_bounds = array<i64: 16, 128>}, {pipeline_mode = #tpu.pipeline_mode<synchronous>, transform_indices = @transform_1, window_bounds = array<i64: 128, 128>}, {pipeline_mode = #tpu.pipeline_mode<synchronous>, transform_indices = @transform_2, window_bounds = array<i64: 1, 128>}, {pipeline_mode = #tpu.pipeline_mode<synchronous>, transform_indices = @transform_3, window_bounds = array<i64: 128, 128>}, {pipeline_mode = #tpu.pipeline_mode<synchronous>, transform_indices = @transform_4, window_bounds = array<i64: 1, 128>}, {pipeline_mode = #tpu.pipeline_mode<synchronous>, transform_indices = @transform_5, window_bounds = array<i64: 128, 128>}, {pipeline_mode = #tpu.pipeline_mode<synchronous>, transform_indices = @transform_6, window_bounds = array<i64: 1, 128>}, {transform_indices = @transform_7, window_bounds = array<i64: 16, 128>}]} {
    %c0 = arith.constant 0 : index
    %c0_0 = arith.constant 0 : index
    %0 = vector.load %arg1[%c0, %c0_0] : memref<16x128xf32, #tpu.memory_space<vmem>>, vector<16x128xf32>
    %c0_1 = arith.constant 0 : index
    %c0_2 = arith.constant 0 : index
    %1 = vector.load %arg2[%c0_1, %c0_2] : memref<128x128xf32, #tpu.memory_space<vmem>>, vector<128x128xf32>
    %cst = arith.constant dense<0.000000e+00> : vector<16x128xf32>
    %2 = tpu.matmul %0, %1, %cst {dimension_numbers = #tpu.dot_dimension_numbers<[1], [0], [0], [1], [0, 0, 1, 1], [], []>} : vector<16x128xf32>, vector<128x128xf32>, vector<16x128xf32> -> vector<16x128xf32>
    %c0_3 = arith.constant 0 : index
    %c0_4 = arith.constant 0 : index
    %3 = vector.load %arg3[%c0_3, %c0_4] : memref<1x128xf32, #tpu.memory_space<vmem>>, vector<1x128xf32>
    %4 = vector.broadcast %3 : vector<1x128xf32> to vector<16x128xf32>
    %5 = arith.addf %2, %4 : vector<16x128xf32>
    %cst_5 = arith.constant 0.000000e+00 : f32
    %6 = vector.broadcast %cst_5 : f32 to vector<16x128xf32>
    %7 = arith.maximumf %5, %6 : vector<16x128xf32>
    %c0_6 = arith.constant 0 : index
    %c0_7 = arith.constant 0 : index
    %8 = vector.load %arg4[%c0_6, %c0_7] : memref<128x128xf32, #tpu.memory_space<vmem>>, vector<128x128xf32>
    %cst_8 = arith.constant dense<0.000000e+00> : vector<16x128xf32>
    %9 = tpu.matmul %7, %8, %cst_8 {dimension_numbers = #tpu.dot_dimension_numbers<[1], [0], [0], [1], [0, 0, 1, 1], [], []>} : vector<16x128xf32>, vector<128x128xf32>, vector<16x128xf32> -> vector<16x128xf32>
    %c0_9 = arith.constant 0 : index
    %c0_10 = arith.constant 0 : index
    %10 = vector.load %arg5[%c0_9, %c0_10] : memref<1x128xf32, #tpu.memory_space<vmem>>, vector<1x128xf32>
    %11 = vector.broadcast %10 : vector<1x128xf32> to vector<16x128xf32>
    %12 = arith.addf %9, %11 : vector<16x128xf32>
    %cst_11 = arith.constant 0.000000e+00 : f32
    %13 = vector.broadcast %cst_11 : f32 to vector<16x128xf32>
    %14 = arith.maximumf %12, %13 : vector<16x128xf32>
    %c0_12 = arith.constant 0 : index
    %c0_13 = arith.constant 0 : index
    %15 = vector.load %arg6[%c0_12, %c0_13] : memref<128x128xf32, #tpu.memory_space<vmem>>, vector<128x128xf32>
    %cst_14 = arith.constant dense<0.000000e+00> : vector<16x128xf32>
    %16 = tpu.matmul %14, %15, %cst_14 {dimension_numbers = #tpu.dot_dimension_numbers<[1], [0], [0], [1], [0, 0, 1, 1], [], []>} : vector<16x128xf32>, vector<128x128xf32>, vector<16x128xf32> -> vector<16x128xf32>
    %c0_15 = arith.constant 0 : index
    %c0_16 = arith.constant 0 : index
    %17 = vector.load %arg7[%c0_15, %c0_16] : memref<1x128xf32, #tpu.memory_space<vmem>>, vector<1x128xf32>
    %18 = vector.broadcast %17 : vector<1x128xf32> to vector<16x128xf32>
    %19 = arith.addf %16, %18 : vector<16x128xf32>
    %cst_17 = arith.constant 0.000000e+00 : f32
    %20 = vector.broadcast %cst_17 : f32 to vector<16x128xf32>
    %21 = arith.maximumf %19, %20 : vector<16x128xf32>
    %c0_18 = arith.constant 0 : index
    %c0_19 = arith.constant 0 : index
    %22 = vector.load %arg8[%c0_18, %c0_19] : memref<16x128xf32, #tpu.memory_space<vmem>>, vector<16x128xf32>
    tpu.vector_store %arg8[%c0_18, %c0_19], %21 {strides = array<i32>} : memref<16x128xf32, #tpu.memory_space<vmem>>, vector<16x128xf32>,
    return
  }
  func.func @transform_0(%arg0: i32) -> (i32, i32) {
    %c0_i32 = arith.constant 0 : i32
    %c0_i32_0 = arith.constant 0 : i32
    return %arg0, %c0_i32 : i32, i32
  }
  func.func @transform_1(%arg0: i32) -> (i32, i32) {
    %c0_i32 = arith.constant 0 : i32
    %c0_i32_0 = arith.constant 0 : i32
    %c0_i32_1 = arith.constant 0 : i32
    return %c0_i32, %c0_i32_0 : i32, i32
  }
  func.func @transform_2(%arg0: i32) -> (i32, i32) {
    %c0_i32 = arith.constant 0 : i32
    %c0_i32_0 = arith.constant 0 : i32
    %c0_i32_1 = arith.constant 0 : i32
    return %c0_i32, %c0_i32_0 : i32, i32
  }
  func.func @transform_3(%arg0: i32) -> (i32, i32) {
    %c0_i32 = arith.constant 0 : i32
    %c0_i32_0 = arith.constant 0 : i32
    %c0_i32_1 = arith.constant 0 : i32
    return %c0_i32, %c0_i32_0 : i32, i32
  }
  func.func @transform_4(%arg0: i32) -> (i32, i32) {
    %c0_i32 = arith.constant 0 : i32
    %c0_i32_0 = arith.constant 0 : i32
    %c0_i32_1 = arith.constant 0 : i32
    return %c0_i32, %c0_i32_0 : i32, i32
  }
  func.func @transform_5(%arg0: i32) -> (i32, i32) {
    %c0_i32 = arith.constant 0 : i32
    %c0_i32_0 = arith.constant 0 : i32
    %c0_i32_1 = arith.constant 0 : i32
    return %c0_i32, %c0_i32_0 : i32, i32
  }
  func.func @transform_6(%arg0: i32) -> (i32, i32) {
    %c0_i32 = arith.constant 0 : i32
    %c0_i32_0 = arith.constant 0 : i32
    %c0_i32_1 = arith.constant 0 : i32
    return %c0_i32, %c0_i32_0 : i32, i32
  }
  func.func @transform_7(%arg0: i32) -> (i32, i32) {
    %c0_i32 = arith.constant 0 : i32
    %c0_i32_0 = arith.constant 0 : i32
    return %arg0, %c0_i32 : i32, i32
  }
}

</mosaic_0001>

<bundles_post_ra>
// kernel: _mlp_padded.1
= control target key start
LH: loop header
LB: loop body
LE: loop exit
PB: predicated region body
PF: predicated region fallthrough
CT: control target
= control target key end

     0   :  { %12 = vsyncpa [#allocation3], 0  ;;  %s933_s0 = inlined_call_operand.hbm [shape: f32[16,128], index: 0, kind: input, shape index: {}]   ;;  %s934_s1 = inlined_call_operand.hbm [shape: f32[128,128], index: 1, kind: input, shape index: {}]   ;;  %s935_s2 = inlined_call_operand.vmem [shape: f32[1,128], index: 2, kind: input, shape index: {}]   ;;  %s936_s3 = inlined_call_operand.hbm [shape: f32[128,128], index: 3, kind: input, shape index: {}]   ;;  %s937_s4 = inlined_call_operand.vmem [shape: f32[1,128], index: 4, kind: input, shape index: {}]   ;;  %s938_s5 = inlined_call_operand.hbm [shape: f32[128,128], index: 5, kind: input, shape index: {}]   ;;  %s939_s6 = inlined_call_operand.vmem [shape: f32[1,128], index: 6, kind: input, shape index: {}]   ;;  %s940_s7 = inlined_call_operand.hbm [shape: f32[16,128], index: 7, kind: output, shape index: {}]  }
   0x1   :  { %13 = vsyncpa [#allocation6], 0 }
   0x2   :  { %14 = vsyncpa [#allocation9], 0 }
   0x3   :  { %15 = vsyncpa [#allocation4], 0  ;;  %s788_s24 = smov [#allocation5]   ;;  %s789_s26 = smov [#allocation2]  }
   0x4   :  { %s33_s25 = sshll.u32 %s788_s24, 4  ;;  %s21_s27 = sshll.u32 %s789_s26, 4  ;;  %s34_s25 = int_to_ptr.vmem [resolvable:$true] %s33_s25  ;;  %s835_s27 = int_to_ptr.vmem [resolvable:$true] %s21_s27 }
   0x5   :  { %s670_s30 = scalar_lea.hbm %s934_s1, 2048 }
   0x6   :  { %p671_p0 = scmp.ne.s32.totalorder %s934_s1, %s670_s30  ;;  %p674_p1 = scmp.lt.u32.totalorder %s670_s30, %s934_s1 }
   0x8   :  { %p676_p2 = pnand %p674_p1, %p671_p0 }
   0xa   :  { %679 = shalt.err (!%p676_p2)
}
   0xb   :  { %s680_s12 = scalar_lea.vmem %s34_s25, 2048  ;;  %p685_p4 = scmp.lt.s32.totalorder %s34_s25, %s34_s25 }
   0xc   :  { %p681_p3 = scmp.ne.s32.totalorder %s34_s25, %s680_s12  ;;  %p686_p5 = scmp.lt.s32.totalorder %s680_s12, %s680_s12 }
   0xe   :  { %p687_p6 = por %p686_p5, %p685_p4 }
  0x10   :  { %p688_p7 = pnand %p687_p6, %p681_p3 }
  0x12   :  { %691 = shalt.err (!%p688_p7)
}
  0x13   :  { %s790_s13 = smov 128   ;;  %s791_s14 = smov 8  }
  0x14   :  { %39 = dma.hbm_to_vmem [thread:$0]  %s934_s1, 2048, %s34_s25, [#allocation6], %s790_s13, %s790_s13, %s791_s14  }
  0x15   :  { %s692_s19 = scalar_lea.hbm %s933_s0, 256 }
  0x16   :  { %p693_p8 = scmp.ne.s32.totalorder %s933_s0, %s692_s19  ;;  %p696_p9 = scmp.lt.u32.totalorder %s692_s19, %s933_s0 }
  0x18   :  { %p698_p10 = pnand %p696_p9, %p693_p8 }
  0x1a   :  { %701 = shalt.err (!%p698_p10)
}
  0x1b   :  { %s702_s24 = scalar_lea.vmem %s835_s27, 256  ;;  %p707_p12 = scmp.lt.s32.totalorder %s835_s27, %s835_s27 }
  0x1c   :  { %p703_p11 = scmp.ne.s32.totalorder %s835_s27, %s702_s24  ;;  %p708_p13 = scmp.lt.s32.totalorder %s702_s24, %s702_s24 }
  0x1e   :  { %p709_p0 = por %p708_p13, %p707_p12 }
  0x20   :  { %p710_p1 = pnand %p709_p0, %p703_p11 }
  0x22   :  { %713 = shalt.err (!%p710_p1)
}
  0x23   :  { %27 = dma.hbm_to_vmem [thread:$0]  %s933_s0, 256, %s835_s27, [#allocation3], %s790_s13, %s790_s13, %s791_s14  }
  0x24   :  { %s792_s26 = smov [#allocation7]   ;;  %s793_s29 = smov [#allocation8]  }
  0x25   :  { %s47_s28 = sshll.u32 %s792_s26, 4  ;;  %s61_s30 = sshll.u32 %s793_s29, 4  ;;  %s48_s28 = int_to_ptr.vmem [resolvable:$true] %s47_s28  ;;  %s872_s30 = int_to_ptr.vmem [resolvable:$true] %s61_s30 }
  0x26   :  { %s714_s10 = scalar_lea.hbm %s936_s3, 2048 }
  0x27   :  { %p715_p2 = scmp.ne.s32.totalorder %s936_s3, %s714_s10  ;;  %p718_p3 = scmp.lt.u32.totalorder %s714_s10, %s936_s3 }
  0x29   :  { %p720_p4 = pnand %p718_p3, %p715_p2 }
  0x2b   :  { %723 = shalt.err (!%p720_p4)
}
  0x2c   :  { %s724_s0 = scalar_lea.vmem %s48_s28, 2048  ;;  %p729_p6 = scmp.lt.s32.totalorder %s48_s28, %s48_s28 }
  0x2d   :  { %p725_p5 = scmp.ne.s32.totalorder %s48_s28, %s724_s0  ;;  %p730_p7 = scmp.lt.s32.totalorder %s724_s0, %s724_s0 }
  0x2f   :  { %p731_p8 = por %p730_p7, %p729_p6 }
  0x31   :  { %p732_p9 = pnand %p731_p8, %p725_p5 }
  0x33   :  { %735 = shalt.err (!%p732_p9)
}
  0x34   :  { %53 = dma.hbm_to_vmem [thread:$0]  %s936_s3, 2048, %s48_s28, [#allocation6], %s790_s13, %s790_s13, %s791_s14  }
  0x35   :  { %s736_s20 = scalar_lea.hbm %s938_s5, 2048 }
  0x36   :  { %p737_p10 = scmp.ne.s32.totalorder %s938_s5, %s736_s20  ;;  %p740_p11 = scmp.lt.u32.totalorder %s736_s20, %s938_s5 }
  0x38   :  { %p742_p12 = pnand %p740_p11, %p737_p10 }
  0x3a   :  { %745 = shalt.err (!%p742_p12)
}
  0x3b   :  { %s746_s1 = scalar_lea.vmem %s872_s30, 2048  ;;  %p751_p0 = scmp.lt.s32.totalorder %s872_s30, %s872_s30 }
  0x3c   :  { %p747_p13 = scmp.ne.s32.totalorder %s872_s30, %s746_s1  ;;  %p752_p1 = scmp.lt.s32.totalorder %s746_s1, %s746_s1 }
  0x3e   :  { %p753_p2 = por %p752_p1, %p751_p0 }
  0x40   :  { %p754_p3 = pnand %p753_p2, %p747_p13 }
  0x42   :  { %757 = shalt.err (!%p754_p3)
}
  0x43   :  { %67 = dma.hbm_to_vmem [thread:$0]  %s938_s5, 2048, %s872_s30, [#allocation9], %s790_s13, %s790_s13, %s791_s14  }
  0x44   :  { %780 = dma.done.wait [#allocation3], 256  }
  0x45   :  { %781 = vsyncadd [#allocation3], 4294967040 }
  0x46   :  { %782 = dma.done.wait [#allocation6], 4096  }
  0x47   :  { %783 = vsyncadd [#allocation6], 4294963200 }
  0x48   :  { %784 = dma.done.wait [#allocation9], 2048  }
  0x49   :  { %785 = vsyncadd [#allocation9], 4294965248  ;;  %v84_v0 = vld [vmem:[#allocation5] sm:$0xff]  ;;  %v85_v1 = vld [vmem:[#allocation5 + $0x8] sm:$0xff]  ;;  %s794_s8 = smov [#allocation10]  }
  0x4a   :  { %v86_v2 = vld [vmem:[#allocation5 + $0x10] sm:$0xff]  ;;  %v567_v3 = vpack.c.bf16 %v85_v1, %v84_v0  ;;  %v87_v4 = vld [vmem:[#allocation5 + $0x18] sm:$0xff]  ;;  %v88_v6 = vld [vmem:[#allocation5 + $0x20] sm:$0xff]  ;;  %s391_s9 = sshll.u32 %s794_s8, 4  ;;  %s392_s9 = int_to_ptr.vmem [resolvable:$true] %s391_s9 }
  0x4b   :  { %v571_v5 = vpack.c.bf16 %v87_v4, %v86_v2  ;;  %v89_v7 = vld [vmem:[#allocation5 + $0x28] sm:$0xff]  ;;  %v90_v9 = vld [vmem:[#allocation5 + $0x30] sm:$0xff]  ;;  %v91_v10 = vld [vmem:[#allocation5 + $0x38] sm:$0xff]  ;;  %p763_p5 = scmp.lt.s32.totalorder %s392_s9, %s392_s9 }
  0x4c   :  { %568 = vmatprep.subr.bf16.mxu0 %v567_v3  ;;  %v575_v8 = vpack.c.bf16 %v89_v7, %v88_v6  ;;  %v82_v11 = vld [vmem:[#allocation2] sm:$0xff]  ;;  %v184_v12 = vld [vmem:[#allocation7] sm:$0xff]  ;;  %v185_v13 = vld [vmem:[#allocation7 + $0x8] sm:$0xff]  ;;  %v579_v20 = vpack.c.bf16 %v91_v10, %v90_v9 }
  0x4d   :  { %570 = vmatpush3.bf16.msra.mxu0 %v567_v3  ;;  %494 = vmatprep.mubr.f32.mxu0 %v82_v11  ;;  %v186_v14 = vld [vmem:[#allocation7 + $0x10] sm:$0xff]  ;;  %v599_v15 = vpack.c.bf16 %v185_v13, %v184_v12  ;;  %v187_v16 = vld [vmem:[#allocation7 + $0x18] sm:$0xff]  ;;  %v188_v18 = vld [vmem:[#allocation7 + $0x20] sm:$0xff] }
  0x4e   :  { %572 = vmatprep.subr.bf16.mxu0 %v571_v5  ;;  %v603_v17 = vpack.c.bf16 %v187_v16, %v186_v14  ;;  %v189_v19 = vld [vmem:[#allocation7 + $0x28] sm:$0xff]  ;;  %v92_v21 = vld [vmem:[#allocation5 + $0x40] sm:$0xff]  ;;  %v190_v24 = vld [vmem:[#allocation7 + $0x30] sm:$0xff] }
  0x4f   :  { %600 = vmatprep.subr.bf16.mxu1 %v599_v15  ;;  %v93_v22 = vld [vmem:[#allocation5 + $0x48] sm:$0xff]  ;;  %v607_v23 = vpack.c.bf16 %v189_v19, %v188_v18  ;;  %v191_v25 = vld [vmem:[#allocation7 + $0x38] sm:$0xff]  ;;  %v94_v27 = vld [vmem:[#allocation5 + $0x50] sm:$0xff] }
  0x50   :  { %602 = vmatpush3.bf16.msra.mxu1 %v599_v15  ;;  %v583_v26 = vpack.c.bf16 %v93_v22, %v92_v21  ;;  %v95_v28 = vld [vmem:[#allocation5 + $0x58] sm:$0xff]  ;;  %v611_v29 = vpack.c.bf16 %v191_v25, %v190_v24  ;;  %v192_v30 = vld [vmem:[#allocation7 + $0x40] sm:$0xff]  ;;  %v193_v31 = vld [vmem:[#allocation7 + $0x48] sm:$0xff] }
  0x51   :  { %574 = vmatpush3.bf16.msra.mxu0 %v571_v5  ;;  %604 = vmatprep.subr.bf16.mxu1 %v603_v17  ;;  %v587_v32 = vpack.c.bf16 %v95_v28, %v94_v27  ;;  %v96_v33 = vld [vmem:[#allocation5 + $0x60] sm:$0xff]  ;;  %v97_v34 = vld [vmem:[#allocation5 + $0x68] sm:$0xff]  ;;  %v615_v35 = vpack.c.bf16 %v193_v31, %v192_v30  ;;  %v194_v36 = vld [vmem:[#allocation7 + $0x50] sm:$0xff] }
  0x52   :  { %576 = vmatprep.subr.bf16.mxu0 %v575_v8  ;;  %v195_v37 = vld [vmem:[#allocation7 + $0x58] sm:$0xff]  ;;  %v591_v38 = vpack.c.bf16 %v97_v34, %v96_v33  ;;  %v98_v39 = vld [vmem:[#allocation5 + $0x70] sm:$0xff]  ;;  %v196_v42 = vld [vmem:[#allocation7 + $0x60] sm:$0xff] }
  0x53   :  { %v99_v40 = vld [vmem:[#allocation5 + $0x78] sm:$0xff]  ;;  %v619_v41 = vpack.c.bf16 %v195_v37, %v194_v36  ;;  %v197_v43 = vld [vmem:[#allocation7 + $0x68] sm:$0xff]  ;;  %v198_v47 = vld [vmem:[#allocation7 + $0x70] sm:$0xff] }
  0x54   :  { %606 = vmatpush3.bf16.msra.mxu1 %v603_v17  ;;  %v595_v44 = vpack.c.bf16 %v99_v40, %v98_v39  ;;  %v623_v45 = vpack.c.bf16 %v197_v43, %v196_v42  ;;  %v83_v46 = vld [vmem:[#allocation2 + $0x8] sm:$0xff]  ;;  %v284_v50 = vld [vmem:[#allocation8] sm:$0xff]  ;;  %v285_v51 = vld [vmem:[#allocation8 + $0x8] sm:$0xff] }
  0x55   :  { %578 = vmatpush3.bf16.msra.mxu0 %v575_v8  ;;  %608 = vmatprep.subr.bf16.mxu1 %v607_v23  ;;  %v199_v48 = vld [vmem:[#allocation7 + $0x78] sm:$0xff]  ;;  %v286_v52 = vld [vmem:[#allocation8 + $0x10] sm:$0xff]  ;;  %v631_v53 = vpack.c.bf16 %v285_v51, %v284_v50  ;;  %v288_v56 = vld [vmem:[#allocation8 + $0x20] sm:$0xff] }
  0x56   :  { %580 = vmatprep.subr.bf16.mxu0 %v579_v20  ;;  %v627_v49 = vpack.c.bf16 %v199_v48, %v198_v47  ;;  %v287_v54 = vld [vmem:[#allocation8 + $0x18] sm:$0xff]  ;;  %v289_v57 = vld [vmem:[#allocation8 + $0x28] sm:$0xff]  ;;  %v290_v59 = vld [vmem:[#allocation8 + $0x30] sm:$0xff] }
  0x57   :  { %v635_v55 = vpack.c.bf16 %v287_v54, %v286_v52  ;;  %v639_v58 = vpack.c.bf16 %v289_v57, %v288_v56  ;;  %v291_v60 = vld [vmem:[#allocation8 + $0x38] sm:$0xff]  ;;  %v292_v62 = vld [vmem:[#allocation8 + $0x40] sm:$0xff]  ;;  %v293_v63 = vld [vmem:[#allocation8 + $0x48] sm:$0xff] }
  0x58   :  { %610 = vmatpush3.bf16.msra.mxu1 %v607_v23  ;;  %v643_v61 = vpack.c.bf16 %v291_v60, %v290_v59  ;;  %v647_v0 = vpack.c.bf16 %v293_v63, %v292_v62  ;;  %v294_v1 = vld [vmem:[#allocation8 + $0x50] sm:$0xff]  ;;  %v295_v2 = vld [vmem:[#allocation8 + $0x58] sm:$0xff]  ;;  %v296_v4 = vld [vmem:[#allocation8 + $0x60] sm:$0xff] }
  0x59   :  { %582 = vmatpush3.bf16.msra.mxu0 %v579_v20  ;;  %612 = vmatprep.subr.bf16.mxu1 %v611_v29  ;;  %v651_v3 = vpack.c.bf16 %v295_v2, %v294_v1  ;;  %v297_v5 = vld [vmem:[#allocation8 + $0x68] sm:$0xff]  ;;  %v405_v7 = vld [vmem:[%s935_s2] ss:$0 sm:$0xff]  ;;  %v299_v15 = vld [vmem:[#allocation8 + $0x78] sm:$0xff] }
  0x5a   :  { %584 = vmatprep.subr.bf16.mxu0 %v583_v26  ;;  %v655_v6 = vpack.c.bf16 %v297_v5, %v296_v4  ;;  %v298_v14 = vld [vmem:[#allocation8 + $0x70] sm:$0xff] }
  0x5b   :  { %v659_v16 = vpack.c.bf16 %v299_v15, %v298_v14  ;;  %v406_v17 = vld [vmem:[%s937_s4] ss:$0 sm:$0xff]  ;;  %s758_s4 = scalar_lea.vmem %s392_s9, 256 }
  0x5c   :  { %614 = vmatpush3.bf16.msra.mxu1 %v611_v29  ;;  %v407_v24 = vld [vmem:[%s939_s6] ss:$0 sm:$0xff]  ;;  %p759_p4 = scmp.ne.s32.totalorder %s392_s9, %s758_s4  ;;  %p764_p6 = scmp.lt.s32.totalorder %s758_s4, %s758_s4 }
  0x5d   :  { %586 = vmatpush3.bf16.msra.mxu0 %v583_v26  ;;  %616 = vmatprep.subr.bf16.mxu1 %v615_v35 }
  0x5e   :  { %588 = vmatprep.subr.bf16.mxu0 %v587_v32  ;;  %p765_p7 = por %p764_p6, %p763_p5 }
  0x60   :  { %618 = vmatpush3.bf16.msra.mxu1 %v615_v35  ;;  %p766_p8 = pnand %p765_p7, %p759_p4 }
  0x61   :  { %590 = vmatpush3.bf16.msra.mxu0 %v587_v32  ;;  %620 = vmatprep.subr.bf16.mxu1 %v619_v41 }
  0x62   :  { %592 = vmatprep.subr.bf16.mxu0 %v591_v38 }
  0x64   :  { %622 = vmatpush3.bf16.msra.mxu1 %v619_v41 }
  0x65   :  { %594 = vmatpush3.bf16.msra.mxu0 %v591_v38  ;;  %624 = vmatprep.subr.bf16.mxu1 %v623_v45 }
  0x66   :  { %596 = vmatprep.subr.bf16.mxu0 %v595_v44 }
  0x68   :  { %626 = vmatpush3.bf16.msra.mxu1 %v623_v45 }
  0x69   :  { %598 = vmatpush3.bf16.msra.mxu0 %v595_v44  ;;  %628 = vmatprep.subr.bf16.mxu1 %v627_v49 }
  0x6a   :  { %632 = vmatprep.subr.bf16.mxu0 %v631_v53 }
  0x6c   :  { %495 = vmatmul.mubr.f32.vlgmr.msra.gmra.mrb[0].mxu0 %v83_v46  ;;  %630 = vmatpush3.bf16.msra.mxu1 %v627_v49 }
  0x6d   :  { %634 = vmatpush3.bf16.msra.mxu0 %v631_v53 }
  0x6e   :  { %636 = vmatprep.subr.bf16.mxu0 %v635_v55 }
  0x71   :  { %638 = vmatpush3.bf16.msra.mxu0 %v635_v55 }
  0x72   :  { %640 = vmatprep.subr.bf16.mxu0 %v639_v58 }
  0x75   :  { %642 = vmatpush3.bf16.msra.mxu0 %v639_v58 }
  0x76   :  { %644 = vmatprep.subr.bf16.mxu0 %v643_v61 }
  0x79   :  { %646 = vmatpush3.bf16.msra.mxu0 %v643_v61 }
  0x7a   :  { %648 = vmatprep.subr.bf16.mxu0 %v647_v0 }
  0x7d   :  { %650 = vmatpush3.bf16.msra.mxu0 %v647_v0 }
  0x7e   :  { %652 = vmatprep.subr.bf16.mxu0 %v651_v3 }
  0x81   :  { %654 = vmatpush3.bf16.msra.mxu0 %v651_v3 }
  0x82   :  { %656 = vmatprep.subr.bf16.mxu0 %v655_v6 }
  0x85   :  { %658 = vmatpush3.bf16.msra.mxu0 %v655_v6 }
  0x86   :  { %660 = vmatprep.subr.bf16.mxu0 %v659_v16 }
  0x89   :  { %662 = vmatpush3.bf16.msra.mxu0 %v659_v16 }
 0x13f   :  { %v496_v8 = vpop.f32.mrb[0].mxu0 }
 0x140   :  { %v179_v9 = vadd.f32 %v496_v8, %v405_v7  ;;  %v173_v10 = vpop.f32.mrb[1].mxu0 }
 0x141   :  { %v174_v11 = vadd.f32 %v405_v7, %v173_v10 }
 0x142   :  { %v183_v13 = vmax.f32 %v179_v9, 0.0 }
 0x143   :  { %v182_v12 = vmax.f32 %v174_v11, 0.0 }
 0x145   :  { %529 = vmatprep.mubr.f32.mxu1 %v182_v12 }
 0x146   :  { %530 = vmatmul.mubr.f32.vlgmr.msra.gmra.mrb[0].mxu1 %v183_v13 }
 0x219   :  { %v531_v18 = vpop.f32.mrb[0].mxu1 }
 0x21a   :  { %v279_v19 = vadd.f32 %v531_v18, %v406_v17  ;;  %v273_v20 = vpop.f32.mrb[1].mxu1 }
 0x21b   :  { %v274_v21 = vadd.f32 %v406_v17, %v273_v20 }
 0x21c   :  { %v283_v23 = vmax.f32 %v279_v19, 0.0 }
 0x21d   :  { %v282_v22 = vmax.f32 %v274_v21, 0.0 }
 0x21f   :  { %564 = vmatprep.mubr.f32.mxu0 %v282_v22 }
 0x220   :  { %565 = vmatmul.mubr.f32.vlgmr.msra.gmra.mrb[2].mxu0 %v283_v23 }
 0x2f3   :  { %v566_v25 = vpop.f32.mrb[2].mxu0 }
 0x2f4   :  { %v379_v26 = vadd.f32 %v566_v25, %v407_v24  ;;  %v373_v27 = vpop.f32.mrb[3].mxu0 }
 0x2f5   :  { %v374_v28 = vadd.f32 %v407_v24, %v373_v27 }
 0x2f6   :  { %v383_v29 = vmax.f32 %v379_v26, 0.0 }
 0x2f7   :  { %v382_v30 = vmax.f32 %v374_v28, 0.0 }
 0x2f8   :  { %385 = vst [vmem:[#allocation10 + $0x8] sm:$0xff] %v383_v29 }
 0x2f9   :  { %384 = vst [vmem:[#allocation10] sm:$0xff] %v382_v30 }
 0x2fa   :  { %769 = shalt.err (!%p766_p8)
}
 0x2fb   :  { %s770_s11 = scalar_lea.hbm %s940_s7, 256 }
 0x2fc   :  { %p771_p9 = scmp.ne.s32.totalorder %s940_s7, %s770_s11  ;;  %p774_p10 = scmp.lt.u32.totalorder %s770_s11, %s940_s7 }
 0x2fe   :  { %p776_p11 = pnand %p774_p10, %p771_p9 }
 0x300   :  { %779 = shalt.err (!%p776_p11)
}
 0x301   :  { %397 = dma.vmem_to_hbm [thread:$0]  %s392_s9, 256, %s940_s7, [#allocation4], %s790_s13, %s790_s13, %s791_s14  }
 0x302   :  { %786 = dma.done.wait [#allocation4], 256  }
 0x303   :  { %787 = vsyncadd [#allocation4], 4294967040 }
 0x304   :  { %401 = vsyncpa [#allocation3], 1 }
 0x305   :  { %402 = vsyncpa [#allocation6], 1 }
 0x306   :  { %403 = vsyncpa [#allocation9], 1 }
 0x307   :  { %404 = vsyncpa [#allocation4], 1 }

// kernel: _mlp_padded.1
= control target key start
LH: loop header
LB: loop body
LE: loop exit
PB: predicated region body
PF: predicated region fallthrough
CT: control target
= control target key end

     0   :  { %12 = vsyncpa [#allocation3], 0  ;;  %s933_s0 = inlined_call_operand.hbm [shape: f32[16,128], index: 0, kind: input, shape index: {}]   ;;  %s934_s1 = inlined_call_operand.hbm [shape: f32[128,128], index: 1, kind: input, shape index: {}]   ;;  %s935_s2 = inlined_call_operand.vmem [shape: f32[1,128], index: 2, kind: input, shape index: {}]   ;;  %s936_s3 = inlined_call_operand.hbm [shape: f32[128,128], index: 3, kind: input, shape index: {}]   ;;  %s937_s4 = inlined_call_operand.vmem [shape: f32[1,128], index: 4, kind: input, shape index: {}]   ;;  %s938_s5 = inlined_call_operand.hbm [shape: f32[128,128], index: 5, kind: input, shape index: {}]   ;;  %s939_s6 = inlined_call_operand.vmem [shape: f32[1,128], index: 6, kind: input, shape index: {}]   ;;  %s940_s7 = inlined_call_operand.hbm [shape: f32[16,128], index: 7, kind: output, shape index: {}]  }
   0x1   :  { %13 = vsyncpa [#allocation6], 0 }
   0x2   :  { %14 = vsyncpa [#allocation9], 0 }
   0x3   :  { %15 = vsyncpa [#allocation4], 0  ;;  %s788_s24 = smov [#allocation5]   ;;  %s789_s26 = smov [#allocation2]  }
   0x4   :  { %s33_s25 = sshll.u32 %s788_s24, 4  ;;  %s21_s27 = sshll.u32 %s789_s26, 4  ;;  %s34_s25 = int_to_ptr.vmem [resolvable:$true] %s33_s25  ;;  %s835_s27 = int_to_ptr.vmem [resolvable:$true] %s21_s27 }
   0x5   :  { %s670_s30 = scalar_lea.hbm %s934_s1, 2048 }
   0x6   :  { %p671_p0 = scmp.ne.s32.totalorder %s934_s1, %s670_s30  ;;  %p674_p1 = scmp.lt.u32.totalorder %s670_s30, %s934_s1 }
   0x8   :  { %p676_p2 = pnand %p674_p1, %p671_p0 }
   0xa   :  { %679 = shalt.err (!%p676_p2)
}
   0xb   :  { %s680_s12 = scalar_lea.vmem %s34_s25, 2048  ;;  %p685_p4 = scmp.lt.s32.totalorder %s34_s25, %s34_s25 }
   0xc   :  { %p681_p3 = scmp.ne.s32.totalorder %s34_s25, %s680_s12  ;;  %p686_p5 = scmp.lt.s32.totalorder %s680_s12, %s680_s12 }
   0xe   :  { %p687_p6 = por %p686_p5, %p685_p4 }
  0x10   :  { %p688_p7 = pnand %p687_p6, %p681_p3 }
  0x12   :  { %691 = shalt.err (!%p688_p7)
}
  0x13   :  { %s790_s13 = smov 128   ;;  %s791_s14 = smov 8  }
  0x14   :  { %39 = dma.hbm_to_vmem [thread:$0]  %s934_s1, 2048, %s34_s25, [#allocation6], %s790_s13, %s790_s13, %s791_s14  }
  0x15   :  { %s692_s19 = scalar_lea.hbm %s933_s0, 256 }
  0x16   :  { %p693_p8 = scmp.ne.s32.totalorder %s933_s0, %s692_s19  ;;  %p696_p9 = scmp.lt.u32.totalorder %s692_s19, %s933_s0 }
  0x18   :  { %p698_p10 = pnand %p696_p9, %p693_p8 }
  0x1a   :  { %701 = shalt.err (!%p698_p10)
}
  0x1b   :  { %s702_s24 = scalar_lea.vmem %s835_s27, 256  ;;  %p707_p12 = scmp.lt.s32.totalorder %s835_s27, %s835_s27 }
  0x1c   :  { %p703_p11 = scmp.ne.s32.totalorder %s835_s27, %s702_s24  ;;  %p708_p13 = scmp.lt.s32.totalorder %s702_s24, %s702_s24 }
  0x1e   :  { %p709_p0 = por %p708_p13, %p707_p12 }
  0x20   :  { %p710_p1 = pnand %p709_p0, %p703_p11 }
  0x22   :  { %713 = shalt.err (!%p710_p1)
}
  0x23   :  { %27 = dma.hbm_to_vmem [thread:$0]  %s933_s0, 256, %s835_s27, [#allocation3], %s790_s13, %s790_s13, %s791_s14  }
  0x24   :  { %s792_s26 = smov [#allocation7]   ;;  %s793_s29 = smov [#allocation8]  }
  0x25   :  { %s47_s28 = sshll.u32 %s792_s26, 4  ;;  %s61_s30 = sshll.u32 %s793_s29, 4  ;;  %s48_s28 = int_to_ptr.vmem [resolvable:$true] %s47_s28  ;;  %s872_s30 = int_to_ptr.vmem [resolvable:$true] %s61_s30 }
  0x26   :  { %s714_s10 = scalar_lea.hbm %s936_s3, 2048 }
  0x27   :  { %p715_p2 = scmp.ne.s32.totalorder %s936_s3, %s714_s10  ;;  %p718_p3 = scmp.lt.u32.totalorder %s714_s10, %s936_s3 }
  0x29   :  { %p720_p4 = pnand %p718_p3, %p715_p2 }
  0x2b   :  { %723 = shalt.err (!%p720_p4)
}
  0x2c   :  { %s724_s0 = scalar_lea.vmem %s48_s28, 2048  ;;  %p729_p6 = scmp.lt.s32.totalorder %s48_s28, %s48_s28 }
  0x2d   :  { %p725_p5 = scmp.ne.s32.totalorder %s48_s28, %s724_s0  ;;  %p730_p7 = scmp.lt.s32.totalorder %s724_s0, %s724_s0 }
  0x2f   :  { %p731_p8 = por %p730_p7, %p729_p6 }
  0x31   :  { %p732_p9 = pnand %p731_p8, %p725_p5 }
  0x33   :  { %735 = shalt.err (!%p732_p9)
}
  0x34   :  { %53 = dma.hbm_to_vmem [thread:$0]  %s936_s3, 2048, %s48_s28, [#allocation6], %s790_s13, %s790_s13, %s791_s14  }
  0x35   :  { %s736_s20 = scalar_lea.hbm %s938_s5, 2048 }
  0x36   :  { %p737_p10 = scmp.ne.s32.totalorder %s938_s5, %s736_s20  ;;  %p740_p11 = scmp.lt.u32.totalorder %s736_s20, %s938_s5 }
  0x38   :  { %p742_p12 = pnand %p740_p11, %p737_p10 }
  0x3a   :  { %745 = shalt.err (!%p742_p12)
}
  0x3b   :  { %s746_s1 = scalar_lea.vmem %s872_s30, 2048  ;;  %p751_p0 = scmp.lt.s32.totalorder %s872_s30, %s872_s30 }
  0x3c   :  { %p747_p13 = scmp.ne.s32.totalorder %s872_s30, %s746_s1  ;;  %p752_p1 = scmp.lt.s32.totalorder %s746_s1, %s746_s1 }
  0x3e   :  { %p753_p2 = por %p752_p1, %p751_p0 }
  0x40   :  { %p754_p3 = pnand %p753_p2, %p747_p13 }
  0x42   :  { %757 = shalt.err (!%p754_p3)
}
  0x43   :  { %67 = dma.hbm_to_vmem [thread:$0]  %s938_s5, 2048, %s872_s30, [#allocation9], %s790_s13, %s790_s13, %s791_s14  }
  0x44   :  { %780 = dma.done.wait [#allocation3], 256  }
  0x45   :  { %781 = vsyncadd [#allocation3], 4294967040 }
  0x46   :  { %782 = dma.done.wait [#allocation6], 4096  }
  0x47   :  { %783 = vsyncadd [#allocation6], 4294963200 }
  0x48   :  { %784 = dma.done.wait [#allocation9], 2048  }
  0x49   :  { %785 = vsyncadd [#allocation9], 4294965248  ;;  %v84_v0 = vld [vmem:[#allocation5] sm:$0xff]  ;;  %v85_v1 = vld [vmem:[#allocation5 + $0x8] sm:$0xff]  ;;  %s794_s8 = smov [#allocation10]  }
  0x4a   :  { %v86_v2 = vld [vmem:[#allocation5 + $0x10] sm:$0xff]  ;;  %v567_v3 = vpack.c.bf16 %v85_v1, %v84_v0  ;;  %v87_v4 = vld [vmem:[#allocation5 + $0x18] sm:$0xff]  ;;  %v88_v6 = vld [vmem:[#allocation5 + $0x20] sm:$0xff]  ;;  %s391_s9 = sshll.u32 %s794_s8, 4  ;;  %s392_s9 = int_to_ptr.vmem [resolvable:$true] %s391_s9 }
  0x4b   :  { %v571_v5 = vpack.c.bf16 %v87_v4, %v86_v2  ;;  %v89_v7 = vld [vmem:[#allocation5 + $0x28] sm:$0xff]  ;;  %v90_v9 = vld [vmem:[#allocation5 + $0x30] sm:$0xff]  ;;  %v91_v10 = vld [vmem:[#allocation5 + $0x38] sm:$0xff]  ;;  %p763_p5 = scmp.lt.s32.totalorder %s392_s9, %s392_s9 }
  0x4c   :  { %568 = vmatprep.subr.bf16.mxu0 %v567_v3  ;;  %v575_v8 = vpack.c.bf16 %v89_v7, %v88_v6  ;;  %v82_v11 = vld [vmem:[#allocation2] sm:$0xff]  ;;  %v184_v12 = vld [vmem:[#allocation7] sm:$0xff]  ;;  %v185_v13 = vld [vmem:[#allocation7 + $0x8] sm:$0xff]  ;;  %v579_v20 = vpack.c.bf16 %v91_v10, %v90_v9 }
  0x4d   :  { %570 = vmatpush3.bf16.msra.mxu0 %v567_v3  ;;  %494 = vmatprep.mubr.f32.mxu0 %v82_v11  ;;  %v186_v14 = vld [vmem:[#allocation7 + $0x10] sm:$0xff]  ;;  %v599_v15 = vpack.c.bf16 %v185_v13, %v184_v12  ;;  %v187_v16 = vld [vmem:[#allocation7 + $0x18] sm:$0xff]  ;;  %v188_v18 = vld [vmem:[#allocation7 + $0x20] sm:$0xff] }
  0x4e   :  { %572 = vmatprep.subr.bf16.mxu0 %v571_v5  ;;  %v603_v17 = vpack.c.bf16 %v187_v16, %v186_v14  ;;  %v189_v19 = vld [vmem:[#allocation7 + $0x28] sm:$0xff]  ;;  %v92_v21 = vld [vmem:[#allocation5 + $0x40] sm:$0xff]  ;;  %v190_v24 = vld [vmem:[#allocation7 + $0x30] sm:$0xff] }
  0x4f   :  { %600 = vmatprep.subr.bf16.mxu1 %v599_v15  ;;  %v93_v22 = vld [vmem:[#allocation5 + $0x48] sm:$0xff]  ;;  %v607_v23 = vpack.c.bf16 %v189_v19, %v188_v18  ;;  %v191_v25 = vld [vmem:[#allocation7 + $0x38] sm:$0xff]  ;;  %v94_v27 = vld [vmem:[#allocation5 + $0x50] sm:$0xff] }
  0x50   :  { %602 = vmatpush3.bf16.msra.mxu1 %v599_v15  ;;  %v583_v26 = vpack.c.bf16 %v93_v22, %v92_v21  ;;  %v95_v28 = vld [vmem:[#allocation5 + $0x58] sm:$0xff]  ;;  %v611_v29 = vpack.c.bf16 %v191_v25, %v190_v24  ;;  %v192_v30 = vld [vmem:[#allocation7 + $0x40] sm:$0xff]  ;;  %v193_v31 = vld [vmem:[#allocation7 + $0x48] sm:$0xff] }
  0x51   :  { %574 = vmatpush3.bf16.msra.mxu0 %v571_v5  ;;  %604 = vmatprep.subr.bf16.mxu1 %v603_v17  ;;  %v587_v32 = vpack.c.bf16 %v95_v28, %v94_v27  ;;  %v96_v33 = vld [vmem:[#allocation5 + $0x60] sm:$0xff]  ;;  %v97_v34 = vld [vmem:[#allocation5 + $0x68] sm:$0xff]  ;;  %v615_v35 = vpack.c.bf16 %v193_v31, %v192_v30  ;;  %v194_v36 = vld [vmem:[#allocation7 + $0x50] sm:$0xff] }
  0x52   :  { %576 = vmatprep.subr.bf16.mxu0 %v575_v8  ;;  %v195_v37 = vld [vmem:[#allocation7 + $0x58] sm:$0xff]  ;;  %v591_v38 = vpack.c.bf16 %v97_v34, %v96_v33  ;;  %v98_v39 = vld [vmem:[#allocation5 + $0x70] sm:$0xff]  ;;  %v196_v42 = vld [vmem:[#allocation7 + $0x60] sm:$0xff] }
  0x53   :  { %v99_v40 = vld [vmem:[#allocation5 + $0x78] sm:$0xff]  ;;  %v619_v41 = vpack.c.bf16 %v195_v37, %v194_v36  ;;  %v197_v43 = vld [vmem:[#allocation7 + $0x68] sm:$0xff]  ;;  %v198_v47 = vld [vmem:[#allocation7 + $0x70] sm:$0xff] }
  0x54   :  { %606 = vmatpush3.bf16.msra.mxu1 %v603_v17  ;;  %v595_v44 = vpack.c.bf16 %v99_v40, %v98_v39  ;;  %v623_v45 = vpack.c.bf16 %v197_v43, %v196_v42  ;;  %v83_v46 = vld [vmem:[#allocation2 + $0x8] sm:$0xff]  ;;  %v284_v50 = vld [vmem:[#allocation8] sm:$0xff]  ;;  %v285_v51 = vld [vmem:[#allocation8 + $0x8] sm:$0xff] }
  0x55   :  { %578 = vmatpush3.bf16.msra.mxu0 %v575_v8  ;;  %608 = vmatprep.subr.bf16.mxu1 %v607_v23  ;;  %v199_v48 = vld [vmem:[#allocation7 + $0x78] sm:$0xff]  ;;  %v286_v52 = vld [vmem:[#allocation8 + $0x10] sm:$0xff]  ;;  %v631_v53 = vpack.c.bf16 %v285_v51, %v284_v50  ;;  %v288_v56 = vld [vmem:[#allocation8 + $0x20] sm:$0xff] }
  0x56   :  { %580 = vmatprep.subr.bf16.mxu0 %v579_v20  ;;  %v627_v49 = vpack.c.bf16 %v199_v48, %v198_v47  ;;  %v287_v54 = vld [vmem:[#allocation8 + $0x18] sm:$0xff]  ;;  %v289_v57 = vld [vmem:[#allocation8 + $0x28] sm:$0xff]  ;;  %v290_v59 = vld [vmem:[#allocation8 + $0x30] sm:$0xff] }
  0x57   :  { %v635_v55 = vpack.c.bf16 %v287_v54, %v286_v52  ;;  %v639_v58 = vpack.c.bf16 %v289_v57, %v288_v56  ;;  %v291_v60 = vld [vmem:[#allocation8 + $0x38] sm:$0xff]  ;;  %v292_v62 = vld [vmem:[#allocation8 + $0x40] sm:$0xff]  ;;  %v293_v63 = vld [vmem:[#allocation8 + $0x48] sm:$0xff] }
  0x58   :  { %610 = vmatpush3.bf16.msra.mxu1 %v607_v23  ;;  %v643_v61 = vpack.c.bf16 %v291_v60, %v290_v59  ;;  %v647_v0 = vpack.c.bf16 %v293_v63, %v292_v62  ;;  %v294_v1 = vld [vmem:[#allocation8 + $0x50] sm:$0xff]  ;;  %v295_v2 = vld [vmem:[#allocation8 + $0x58] sm:$0xff]  ;;  %v296_v4 = vld [vmem:[#allocation8 + $0x60] sm:$0xff] }
  0x59   :  { %582 = vmatpush3.bf16.msra.mxu0 %v579_v20  ;;  %612 = vmatprep.subr.bf16.mxu1 %v611_v29  ;;  %v651_v3 = vpack.c.bf16 %v295_v2, %v294_v1  ;;  %v297_v5 = vld [vmem:[#allocation8 + $0x68] sm:$0xff]  ;;  %v405_v7 = vld [vmem:[%s935_s2] ss:$0 sm:$0xff]  ;;  %v299_v15 = vld [vmem:[#allocation8 + $0x78] sm:$0xff] }
  0x5a   :  { %584 = vmatprep.subr.bf16.mxu0 %v583_v26  ;;  %v655_v6 = vpack.c.bf16 %v297_v5, %v296_v4  ;;  %v298_v14 = vld [vmem:[#allocation8 + $0x70] sm:$0xff] }
  0x5b   :  { %v659_v16 = vpack.c.bf16 %v299_v15, %v298_v14  ;;  %v406_v17 = vld [vmem:[%s937_s4] ss:$0 sm:$0xff]  ;;  %s758_s4 = scalar_lea.vmem %s392_s9, 256 }
  0x5c   :  { %614 = vmatpush3.bf16.msra.mxu1 %v611_v29  ;;  %v407_v24 = vld [vmem:[%s939_s6] ss:$0 sm:$0xff]  ;;  %p759_p4 = scmp.ne.s32.totalorder %s392_s9, %s758_s4  ;;  %p764_p6 = scmp.lt.s32.totalorder %s758_s4, %s758_s4 }
  0x5d   :  { %586 = vmatpush3.bf16.msra.mxu0 %v583_v26  ;;  %616 = vmatprep.subr.bf16.mxu1 %v615_v35 }
  0x5e   :  { %588 = vmatprep.subr.bf16.mxu0 %v587_v32  ;;  %p765_p7 = por %p764_p6, %p763_p5 }
  0x60   :  { %618 = vmatpush3.bf16.msra.mxu1 %v615_v35  ;;  %p766_p8 = pnand %p765_p7, %p759_p4 }
  0x61   :  { %590 = vmatpush3.bf16.msra.mxu0 %v587_v32  ;;  %620 = vmatprep.subr.bf16.mxu1 %v619_v41 }
  0x62   :  { %592 = vmatprep.subr.bf16.mxu0 %v591_v38 }
  0x64   :  { %622 = vmatpush3.bf16.msra.mxu1 %v619_v41 }
  0x65   :  { %594 = vmatpush3.bf16.msra.mxu0 %v591_v38  ;;  %624 = vmatprep.subr.bf16.mxu1 %v623_v45 }
  0x66   :  { %596 = vmatprep.subr.bf16.mxu0 %v595_v44 }
  0x68   :  { %626 = vmatpush3.bf16.msra.mxu1 %v623_v45 }
  0x69   :  { %598 = vmatpush3.bf16.msra.mxu0 %v595_v44  ;;  %628 = vmatprep.subr.bf16.mxu1 %v627_v49 }
  0x6a   :  { %632 = vmatprep.subr.bf16.mxu0 %v631_v53 }
  0x6c   :  { %495 = vmatmul.mubr.f32.vlgmr.msra.gmra.mrb[0].mxu0 %v83_v46  ;;  %630 = vmatpush3.bf16.msra.mxu1 %v627_v49 }
  0x6d   :  { %634 = vmatpush3.bf16.msra.mxu0 %v631_v53 }
  0x6e   :  { %636 = vmatprep.subr.bf16.mxu0 %v635_v55 }
  0x71   :  { %638 = vmatpush3.bf16.msra.mxu0 %v635_v55 }
  0x72   :  { %640 = vmatprep.subr.bf16.mxu0 %v639_v58 }
  0x75   :  { %642 = vmatpush3.bf16.msra.mxu0 %v639_v58 }
  0x76   :  { %644 = vmatprep.subr.bf16.mxu0 %v643_v61 }
  0x79   :  { %646 = vmatpush3.bf16.msra.mxu0 %v643_v61 }
  0x7a   :  { %648 = vmatprep.subr.bf16.mxu0 %v647_v0 }
  0x7d   :  { %650 = vmatpush3.bf16.msra.mxu0 %v647_v0 }
  0x7e   :  { %652 = vmatprep.subr.bf16.mxu0 %v651_v3 }
  0x81   :  { %654 = vmatpush3.bf16.msra.mxu0 %v651_v3 }
  0x82   :  { %656 = vmatprep.subr.bf16.mxu0 %v655_v6 }
  0x85   :  { %658 = vmatpush3.bf16.msra.mxu0 %v655_v6 }
  0x86   :  { %660 = vmatprep.subr.bf16.mxu0 %v659_v16 }
  0x89   :  { %662 = vmatpush3.bf16.msra.mxu0 %v659_v16 }
 0x13f   :  { %v496_v8 = vpop.f32.mrb[0].mxu0 }
 0x140   :  { %v179_v9 = vadd.f32 %v496_v8, %v405_v7  ;;  %v173_v10 = vpop.f32.mrb[1].mxu0 }
 0x141   :  { %v174_v11 = vadd.f32 %v405_v7, %v173_v10 }
 0x142   :  { %v183_v13 = vmax.f32 %v179_v9, 0.0 }
 0x143   :  { %v182_v12 = vmax.f32 %v174_v11, 0.0 }
 0x145   :  { %529 = vmatprep.mubr.f32.mxu1 %v182_v12 }
 0x146   :  { %530 = vmatmul.mubr.f32.vlgmr.msra.gmra.mrb[0].mxu1 %v183_v13 }
 0x219   :  { %v531_v18 = vpop.f32.mrb[0].mxu1 }
 0x21a   :  { %v279_v19 = vadd.f32 %v531_v18, %v406_v17  ;;  %v273_v20 = vpop.f32.mrb[1].mxu1 }
 0x21b   :  { %v274_v21 = vadd.f32 %v406_v17, %v273_v20 }
 0x21c   :  { %v283_v23 = vmax.f32 %v279_v19, 0.0 }
 0x21d   :  { %v282_v22 = vmax.f32 %v274_v21, 0.0 }
 0x21f   :  { %564 = vmatprep.mubr.f32.mxu0 %v282_v22 }
 0x220   :  { %565 = vmatmul.mubr.f32.vlgmr.msra.gmra.mrb[2].mxu0 %v283_v23 }
 0x2f3   :  { %v566_v25 = vpop.f32.mrb[2].mxu0 }
 0x2f4   :  { %v379_v26 = vadd.f32 %v566_v25, %v407_v24  ;;  %v373_v27 = vpop.f32.mrb[3].mxu0 }
 0x2f5   :  { %v374_v28 = vadd.f32 %v407_v24, %v373_v27 }
 0x2f6   :  { %v383_v29 = vmax.f32 %v379_v26, 0.0 }
 0x2f7   :  { %v382_v30 = vmax.f32 %v374_v28, 0.0 }
 0x2f8   :  { %385 = vst [vmem:[#allocation10 + $0x8] sm:$0xff] %v383_v29 }
 0x2f9   :  { %384 = vst [vmem:[#allocation10] sm:$0xff] %v382_v30 }
 0x2fa   :  { %769 = shalt.err (!%p766_p8)
}
 0x2fb   :  { %s770_s11 = scalar_lea.hbm %s940_s7, 256 }
 0x2fc   :  { %p771_p9 = scmp.ne.s32.totalorder %s940_s7, %s770_s11  ;;  %p774_p10 = scmp.lt.u32.totalorder %s770_s11, %s940_s7 }
 0x2fe   :  { %p776_p11 = pnand %p774_p10, %p771_p9 }
 0x300   :  { %779 = shalt.err (!%p776_p11)
}
 0x301   :  { %397 = dma.vmem_to_hbm [thread:$0]  %s392_s9, 256, %s940_s7, [#allocation4], %s790_s13, %s790_s13, %s791_s14  }
 0x302   :  { %786 = dma.done.wait [#allocation4], 256  }
 0x303   :  { %787 = vsyncadd [#allocation4], 4294967040 }
 0x304   :  { %401 = vsyncpa [#allocation3], 1 }
 0x305   :  { %402 = vsyncpa [#allocation6], 1 }
 0x306   :  { %403 = vsyncpa [#allocation9], 1 }
 0x307   :  { %404 = vsyncpa [#allocation4], 1 }

</bundles_post_ra>
